<compile_context>
chip_gen: v7x
topology: tpu7x:2x2x1
jax: 0.10.0
libtpu: 0.0.40
codegen_flags: <defaults>
</compile_context>

<pallas_src>
import functools

import jax
import jax.numpy as jnp
from jax.experimental import pallas as pl
from jax.experimental.pallas import tpu as pltpu

_NEG_BIG = -1e30        # finite sentinel; never exponentiated unsafely
_NEG_SLOPE = 0.2        # DGL GATConv default leaky-relu slope


# -----------------------------------------------------------------------------
# Shared forward math (used by the Pallas kernel AND the precision-matched
# reference; `recip` is pl.reciprocal in-kernel and exact 1/x in the reference).
# -----------------------------------------------------------------------------
def _gat_math(xv, maskf, w1_aug, aux1, w2_aug, aux2, *,
              heads1, f1, f2, neg_slope, recip):
    H, F1, F2 = heads1, f1, f2
    HF1 = H * F1
    N = xv.shape[0]

    mask2 = maskf > 0.0                                   # (N, N)   layer-2 mask
    mask1 = jnp.concatenate([maskf] * H, axis=0) > 0.0    # (H*N, N) head-stacked

    al_bd = aux1[0:H, :]                  # (H, H*F1) block-diagonal a_l
    colmask = aux1[H:2 * H, :]            # (H, H*F1) head-block column selector
    b1 = aux1[2 * H:2 * H + 1, :]         # (1, H*F1)

    # ---------------- layer 1: fc + folded destination attention --------------
    x_bf = xv.astype(jnp.bfloat16)
    z1 = jnp.dot(x_bf, w1_aug.astype(jnp.bfloat16),
                 preferred_element_type=jnp.float32)      # (N, H*F1 + H)
    feat1 = z1[:, :HF1]                                   # (N, H*F1)
    er1 = z1[:, HF1:HF1 + H]                              # (N, H): er1[:, h] = a_r_h . feat_h
    feat1_bf = feat1.astype(jnp.bfloat16)
    # Source-side term for all heads in ONE lane-contracting matmul: (H, N).
    el1 = jnp.einsum("hc,nc->hn", al_bd.astype(jnp.bfloat16), feat1_bf,
                     preferred_element_type=jnp.float32)

    # e stacked head-major along sublanes: rows [h*N, (h+1)*N) belong to head h.
    e_all = jnp.concatenate(
        [er1[:, h:h + 1] + el1[h:h + 1, :] for h in range(H)], axis=0)  # (H*N, N)

    # One batched masked edge-softmax for all heads.
    e_all = jnp.maximum(e_all, neg_slope * e_all)         # leaky_relu (slope in (0,1))
    z = jnp.where(mask1, e_all, _NEG_BIG)
    m = jnp.max(z, axis=-1, keepdims=True)
    # Keep the post-exp select: with allow_zero_in_degree=True an all-masked row
    # must yield alpha == 0 (DGL semantics), not a uniform distribution.
    p = jnp.where(mask1, jnp.exp(z - m), 0.0)
    denom = jnp.maximum(jnp.sum(p, axis=-1, keepdims=True), 1e-30)
    alpha = p * recip(denom)                              # (H*N, N)

    # One aggregation matmul for all heads; assemble the (N, H*F1) "view" slab
    # from the head-diagonal blocks (no lane slices, no lane concatenation).
    agg = jnp.dot(alpha.astype(jnp.bfloat16), feat1_bf,
                  preferred_element_type=jnp.float32)     # (H*N, H*F1)
    h1 = b1
    for h in range(H):
        h1 = h1 + agg[h * N:(h + 1) * N, :] * colmask[h:h + 1, :]
    # F.elu between the layers (feat_drop == attn_drop == 0, so fusing is exact).
    h1 = jnp.where(h1 > 0, h1, jnp.exp(h1) - 1.0)         # (N, H*F1)

    # ---------------- layer 2: single head ------------------------------------
    al2 = aux2[0:1, :]
    b2 = aux2[1:2, :]
    h1_bf = h1.astype(jnp.bfloat16)
    z2 = jnp.dot(h1_bf, w2_aug.astype(jnp.bfloat16),
                 preferred_element_type=jnp.float32)      # (N, F2 + 1)
    feat2 = z2[:, :F2]
    er2 = z2[:, F2:F2 + 1]                                # (N, 1) folded a_r2 . feat2
    feat2_bf = feat2.astype(jnp.bfloat16)
    el2 = jnp.einsum("hf,nf->hn", al2.astype(jnp.bfloat16), feat2_bf,
                     preferred_element_type=jnp.float32)  # (1, N)
    e2 = er2 + el2
    e2 = jnp.maximum(e2, neg_slope * e2)
    z2m = jnp.where(mask2, e2, _NEG_BIG)
    m2 = jnp.max(z2m, axis=-1, keepdims=True)
    p2 = jnp.where(mask2, jnp.exp(z2m - m2), 0.0)
    denom2 = jnp.maximum(jnp.sum(p2, axis=-1, keepdims=True), 1e-30)
    alpha2 = p2 * recip(denom2)
    rst2 = jnp.dot(alpha2.astype(jnp.bfloat16), feat2_bf,
                   preferred_element_type=jnp.float32)    # (N, F2)
    return rst2 + b2


# -----------------------------------------------------------------------------
# Fused 2-layer GAT forward kernel (single grid step; everything stays in VMEM)
# -----------------------------------------------------------------------------
def gat_fused_kernel(x_ref, mask_ref, w1_ref, aux1_ref, w2_ref, aux2_ref,
                     out_ref, *, heads1, f1, f2, neg_slope):
    # int8 adjacency (4x less HBM than f32); one cheap convert, then reused by
    # all attention blocks of both layers.
    maskf = mask_ref[...].astype(jnp.float32)
    out = _gat_math(x_ref[...], maskf, w1_ref[...], aux1_ref[...],
                    w2_ref[...], aux2_ref[...],
                    heads1=heads1, f1=f1, f2=f2, neg_slope=neg_slope,
                    recip=lambda d: pl.reciprocal(d, approx=True))
    out_ref[...] = out.astype(out_ref.dtype)


# -----------------------------------------------------------------------------
# Wrapper: jit-time parameter packing (attention folds, block-diagonals) and a
# single pallas_call launch.
# -----------------------------------------------------------------------------
def _pack_operands(adj, x, params):
    _, f_in = x.shape
    heads1, _, f1 = params["w1"].shape
    f2 = params["w2"].shape[-1]
    hf1 = heads1 * f1

    # fc weights in head-major "view" column layout (matches h.view(-1, H*F)).
    w1_all = jnp.transpose(params["w1"], (1, 0, 2)).reshape(f_in, hf1)
    al1 = params["al1"].reshape(heads1, f1)
    ar1 = params["ar1"].reshape(heads1, f1)
    eye = jnp.eye(heads1, dtype=x.dtype)
    # Block-diagonal attention matrices:
    #   ar_bd[h*F1+f, h] = ar1[h, f]     (H*F1, H)
    #   al_bd[h, h*F1+f] = al1[h, f]     (H, H*F1)
    ar_bd = jnp.einsum("hf,hg->hfg", ar1, eye).reshape(hf1, heads1)
    al_bd = jnp.einsum("hf,hg->ghf", al1, eye).reshape(heads1, hf1)
    # Fold destination-side attention into the fc matmul: x@W1_aug = [feat1|er].
    w1_aug = jnp.concatenate([w1_all, w1_all @ ar_bd], axis=1)   # (F_in, H*F1+H)
    # Head-block column selector used to assemble the (N, H*F1) view slab.
    colmask = (jnp.arange(hf1)[None, :] // f1
               == jnp.arange(heads1)[:, None]).astype(x.dtype)   # (H, H*F1)
    b1 = params["b1"].reshape(1, hf1)
    aux1 = jnp.concatenate([al_bd, colmask, b1], axis=0)         # (2H+1, H*F1)

    w2 = params["w2"][0]                                         # (H*F1, F2)
    w2_aug = jnp.concatenate([w2, w2 @ params["ar2"].reshape(f2, 1)], axis=1)
    aux2 = jnp.concatenate([params["al2"].reshape(1, f2),
                            params["b2"].reshape(1, f2)], axis=0)  # (2, F2)

    mask_i8 = (adj > 0).astype(jnp.int8)                         # compact adjacency
    return (x, mask_i8, w1_aug, aux1, w2_aug, aux2), (heads1, f1, f2)


@jax.jit
def gat_forward(adj, x, params):
    operands, (heads1, f1, f2) = _pack_operands(adj, x, params)
    n = x.shape[0]
    kernel = functools.partial(gat_fused_kernel, heads1=heads1, f1=f1, f2=f2,
                               neg_slope=_NEG_SLOPE)
    return pl.pallas_call(
        kernel,
        out_shape=jax.ShapeDtypeStruct((n, f2), jnp.float32),
        grid=(1,),
        in_specs=[pl.BlockSpec(a.shape, lambda i: (0, 0)) for a in operands],
        out_specs=pl.BlockSpec((n, f2), lambda i: (0, 0)),
        # TODO(synk): when batching graphs / tiling dst nodes, mark that grid
        # axis "parallel" so v7x's 2 TensorCores split the work.
        compiler_params=pltpu.CompilerParams(
            dimension_semantics=("arbitrary",)),
    )(*operands)


# -----------------------------------------------------------------------------
# References.
#   gat_forward_matched_ref: identical math to the kernel (bf16 MXU inputs,
#     same folds), exact reciprocal — tight check on kernel plumbing.
#   gat_module_ref: straightforward per-head float32 module semantics.
# -----------------------------------------------------------------------------
def gat_forward_matched_ref(adj, x, params):
    (xv, mask_i8, w1_aug, aux1, w2_aug, aux2), dims = _pack_operands(adj, x, params)
    heads1, f1, f2 = dims
    return _gat_math(xv, mask_i8.astype(jnp.float32), w1_aug, aux1, w2_aug, aux2,
                     heads1=heads1, f1=f1, f2=f2, neg_slope=_NEG_SLOPE,
                     recip=lambda d: 1.0 / d)


def _attend_ref(feat, al, ar, mask, neg_slope):
    el = jnp.einsum("hf,nf->hn", al, feat)          # (1, N)
    er = jnp.einsum("nf,hf->nh", feat, ar)          # (N, 1)
    e = er + el
    e = jnp.maximum(e, neg_slope * e)
    z = jnp.where(mask, e, _NEG_BIG)
    m = jnp.max(z, axis=-1, keepdims=True)
    p = jnp.where(mask, jnp.exp(z - m), 0.0)
    denom = jnp.maximum(jnp.sum(p, axis=-1, keepdims=True), 1e-30)
    return jnp.dot(p / denom, feat)


def gat_module_ref(adj, x, params):
    mask = adj > 0
    heads1, f_in, f1 = params["w1"].shape
    w1_all = jnp.transpose(params["w1"], (1, 0, 2)).reshape(f_in, heads1 * f1)
    feat1 = x @ w1_all
    outs = [_attend_ref(feat1[:, h * f1:(h + 1) * f1], params["al1"][h],
                        params["ar1"][h], mask, _NEG_SLOPE)
            for h in range(heads1)]
    h1 = jnp.concatenate(outs, axis=-1) + params["b1"].reshape(1, -1)
    h1 = jnp.where(h1 > 0, h1, jnp.exp(h1) - 1.0)
    feat2 = h1 @ params["w2"][0]
    rst2 = _attend_ref(feat2, params["al2"][0], params["ar2"][0], mask, _NEG_SLOPE)
    return rst2 + params["b2"].reshape(1, -1)


# -----------------------------------------------------------------------------
# Main
# -----------------------------------------------------------------------------
if __name__ == "__main__":
    N = 16          # number of graph nodes
    in_feats = 8
    h_feats = 8
    heads = 4

    key = jax.random.PRNGKey(0)
    keys = jax.random.split(key, 12)

    # Node features
    x = jax.random.normal(keys[0], (N, in_feats), dtype=jnp.float32)

    # Deterministic random graph (dense adjacency mask, row=dst, col=src),
    # plus self-loops so every node has in-degree >= 1.
    adj = (jax.random.uniform(keys[1], (N, N)) < 0.3).astype(jnp.float32)
    adj = jnp.maximum(adj, jnp.eye(N, dtype=jnp.float32))

    s = 0.3
    params = {
        # Layer 1: fc (in_feats -> heads*h_feats), attn_l/attn_r, bias
        "w1": s * jax.random.normal(keys[2], (heads, in_feats, h_feats),
                                    dtype=jnp.float32),
        "al1": s * jax.random.normal(keys[3], (heads, 1, h_feats),
                                     dtype=jnp.float32),
        "ar1": s * jax.random.normal(keys[4], (heads, 1, h_feats),
                                     dtype=jnp.float32),
        "b1": s * jax.random.normal(keys[5], (heads, 1, h_feats),
                                    dtype=jnp.float32),
        # Layer 2: fc (heads*h_feats -> h_feats), 1 head
        "w2": s * jax.random.normal(keys[6], (1, heads * h_feats, h_feats),
                                    dtype=jnp.float32),
        "al2": s * jax.random.normal(keys[7], (1, 1, h_feats),
                                     dtype=jnp.float32),
        "ar2": s * jax.random.normal(keys[8], (1, 1, h_feats),
                                     dtype=jnp.float32),
        "b2": s * jax.random.normal(keys[9], (1, 1, h_feats),
                                    dtype=jnp.float32),
    }

    out = jax.block_until_ready(gat_forward(adj, x, params))
    assert out.shape == (N, h_feats)
    assert bool(jnp.all(jnp.isfinite(out)))

    # (1) Plumbing check against a reference with identical folds / bf16 MXU
    #     inputs (only differences: approx reciprocal, compiler reassociation).
    ref_matched = gat_forward_matched_ref(adj, x, params)
    err_matched = float(jnp.max(jnp.abs(out - ref_matched)))
    # (2) Semantic sanity vs straightforward float32 module math; deviations
    #     are only the intentional bf16 rounding of MXU inputs.
    ref_f32 = gat_module_ref(adj, x, params)
    err_f32 = float(jnp.max(jnp.abs(out - ref_f32)))

    assert err_matched < 2e-2, f"mismatch vs precision-matched ref: {err_matched}"
    assert err_f32 < 1.5e-1, f"mismatch vs float32 reference: {err_f32}"

    print("KERNEL_OK")
</pallas_src>

<mosaic_0001>
module attributes {stable_mosaic.version = 11 : i64} {
  func.func @gat_fused_kernel(%arg0: i32, %arg1: memref<16x8xf32, #tpu.memory_space<vmem>>, %arg2: memref<16x16xi8, #tpu.memory_space<vmem>>, %arg3: memref<8x36xf32, #tpu.memory_space<vmem>>, %arg4: memref<9x32xf32, #tpu.memory_space<vmem>>, %arg5: memref<32x9xf32, #tpu.memory_space<vmem>>, %arg6: memref<2x8xf32, #tpu.memory_space<vmem>>, %arg7: memref<16x8xf32, #tpu.memory_space<vmem>>) attributes {dimension_semantics = [#tpu.dimension_semantics<arbitrary>], iteration_bounds = array<i64: 1>, scalar_prefetch = 0 : i64, scratch_operands = 0 : i64, tpu.core_type = #tpu.core_type<tc>, window_params = [{pipeline_mode = #tpu.pipeline_mode<synchronous>, transform_indices = @transform_0, window_bounds = array<i64: 16, 8>}, {pipeline_mode = #tpu.pipeline_mode<synchronous>, transform_indices = @transform_1, window_bounds = array<i64: 16, 16>}, {pipeline_mode = #tpu.pipeline_mode<synchronous>, transform_indices = @transform_2, window_bounds = array<i64: 8, 36>}, {pipeline_mode = #tpu.pipeline_mode<synchronous>, transform_indices = @transform_3, window_bounds = array<i64: 9, 32>}, {pipeline_mode = #tpu.pipeline_mode<synchronous>, transform_indices = @transform_4, window_bounds = array<i64: 32, 9>}, {pipeline_mode = #tpu.pipeline_mode<synchronous>, transform_indices = @transform_5, window_bounds = array<i64: 2, 8>}, {pipeline_mode = #tpu.pipeline_mode<synchronous>, transform_indices = @transform_6, window_bounds = array<i64: 16, 8>}]} {
    %c0 = arith.constant 0 : index
    %c0_0 = arith.constant 0 : index
    %0 = vector.load %arg2[%c0, %c0_0] : memref<16x16xi8, #tpu.memory_space<vmem>>, vector<16x16xi8>
    %1 = arith.sitofp %0 : vector<16x16xi8> to vector<16x16xf32>
    %c0_1 = arith.constant 0 : index
    %c0_2 = arith.constant 0 : index
    %2 = vector.load %arg1[%c0_1, %c0_2] : memref<16x8xf32, #tpu.memory_space<vmem>>, vector<16x8xf32>
    %c0_3 = arith.constant 0 : index
    %c0_4 = arith.constant 0 : index
    %3 = vector.load %arg3[%c0_3, %c0_4] : memref<8x36xf32, #tpu.memory_space<vmem>>, vector<8x36xf32>
    %c0_5 = arith.constant 0 : index
    %c0_6 = arith.constant 0 : index
    %4 = vector.load %arg4[%c0_5, %c0_6] : memref<9x32xf32, #tpu.memory_space<vmem>>, vector<9x32xf32>
    %c0_7 = arith.constant 0 : index
    %c0_8 = arith.constant 0 : index
    %5 = vector.load %arg5[%c0_7, %c0_8] : memref<32x9xf32, #tpu.memory_space<vmem>>, vector<32x9xf32>
    %c0_9 = arith.constant 0 : index
    %c0_10 = arith.constant 0 : index
    %6 = vector.load %arg6[%c0_9, %c0_10] : memref<2x8xf32, #tpu.memory_space<vmem>>, vector<2x8xf32>
    %cst = arith.constant 0.000000e+00 : f32
    %7 = vector.broadcast %cst : f32 to vector<16x16xf32>
    %8 = arith.cmpf ogt, %1, %7 : vector<16x16xf32>
    %9 = tpu.concatenate %1, %1, %1, %1 in 0 : vector<16x16xf32>, vector<16x16xf32>, vector<16x16xf32>, vector<16x16xf32> -> vector<64x16xf32>
    %cst_11 = arith.constant 0.000000e+00 : f32
    %10 = vector.broadcast %cst_11 : f32 to vector<64x16xf32>
    %11 = arith.cmpf ogt, %9, %10 : vector<64x16xf32>
    %12 = vector.extract_strided_slice %4 {offsets = [0, 0], sizes = [4, 32], strides = [1, 1]} : vector<9x32xf32> to vector<4x32xf32>
    %13 = vector.extract_strided_slice %4 {offsets = [4, 0], sizes = [4, 32], strides = [1, 1]} : vector<9x32xf32> to vector<4x32xf32>
    %14 = vector.extract_strided_slice %4 {offsets = [8, 0], sizes = [1, 32], strides = [1, 1]} : vector<9x32xf32> to vector<1x32xf32>
    %15 = arith.truncf %2 : vector<16x8xf32> to vector<16x8xbf16>
    %16 = arith.truncf %3 : vector<8x36xf32> to vector<8x36xbf16>
    %cst_12 = arith.constant dense<0.000000e+00> : vector<16x36xf32>
    %17 = tpu.matmul %15, %16, %cst_12 {dimension_numbers = #tpu.dot_dimension_numbers<[1], [0], [0], [1], [0, 0, 1, 1], [], []>} : vector<16x8xbf16>, vector<8x36xbf16>, vector<16x36xf32> -> vector<16x36xf32>
    %18 = vector.extract_strided_slice %17 {offsets = [0, 0], sizes = [16, 32], strides = [1, 1]} : vector<16x36xf32> to vector<16x32xf32>
    %19 = vector.extract_strided_slice %17 {offsets = [0, 32], sizes = [16, 4], strides = [1, 1]} : vector<16x36xf32> to vector<16x4xf32>
    %20 = arith.truncf %18 : vector<16x32xf32> to vector<16x32xbf16>
    %21 = arith.truncf %12 : vector<4x32xf32> to vector<4x32xbf16>
    "tpu.trace_start"() <{level = 10 : i32, message = "hc,nc->hn"}> : () -> ()
    %cst_13 = arith.constant dense<0.000000e+00> : vector<4x16xf32>
    %22 = tpu.matmul %21, %20, %cst_13 {dimension_numbers = #tpu.dot_dimension_numbers<[1], [1], [0], [0], [0, 0, 1, 0], [], []>} : vector<4x32xbf16>, vector<16x32xbf16>, vector<4x16xf32> -> vector<4x16xf32>
    "tpu.trace_stop"() : () -> ()
    %23 = vector.extract_strided_slice %19 {offsets = [0, 0], sizes = [16, 1], strides = [1, 1]} : vector<16x4xf32> to vector<16x1xf32>
    %24 = vector.extract_strided_slice %22 {offsets = [0, 0], sizes = [1, 16], strides = [1, 1]} : vector<4x16xf32> to vector<1x16xf32>
    %25 = vector.broadcast %23 : vector<16x1xf32> to vector<16x16xf32>
    %26 = vector.broadcast %24 : vector<1x16xf32> to vector<16x16xf32>
    %27 = arith.addf %25, %26 : vector<16x16xf32>
    %28 = vector.extract_strided_slice %19 {offsets = [0, 1], sizes = [16, 1], strides = [1, 1]} : vector<16x4xf32> to vector<16x1xf32>
    %29 = vector.extract_strided_slice %22 {offsets = [1, 0], sizes = [1, 16], strides = [1, 1]} : vector<4x16xf32> to vector<1x16xf32>
    %30 = vector.broadcast %28 : vector<16x1xf32> to vector<16x16xf32>
    %31 = vector.broadcast %29 : vector<1x16xf32> to vector<16x16xf32>
    %32 = arith.addf %30, %31 : vector<16x16xf32>
    %33 = vector.extract_strided_slice %19 {offsets = [0, 2], sizes = [16, 1], strides = [1, 1]} : vector<16x4xf32> to vector<16x1xf32>
    %34 = vector.extract_strided_slice %22 {offsets = [2, 0], sizes = [1, 16], strides = [1, 1]} : vector<4x16xf32> to vector<1x16xf32>
    %35 = vector.broadcast %33 : vector<16x1xf32> to vector<16x16xf32>
    %36 = vector.broadcast %34 : vector<1x16xf32> to vector<16x16xf32>
    %37 = arith.addf %35, %36 : vector<16x16xf32>
    %38 = vector.extract_strided_slice %19 {offsets = [0, 3], sizes = [16, 1], strides = [1, 1]} : vector<16x4xf32> to vector<16x1xf32>
    %39 = vector.extract_strided_slice %22 {offsets = [3, 0], sizes = [1, 16], strides = [1, 1]} : vector<4x16xf32> to vector<1x16xf32>
    %40 = vector.broadcast %38 : vector<16x1xf32> to vector<16x16xf32>
    %41 = vector.broadcast %39 : vector<1x16xf32> to vector<16x16xf32>
    %42 = arith.addf %40, %41 : vector<16x16xf32>
    %43 = tpu.concatenate %27, %32, %37, %42 in 0 : vector<16x16xf32>, vector<16x16xf32>, vector<16x16xf32>, vector<16x16xf32> -> vector<64x16xf32>
    %cst_14 = arith.constant 2.000000e-01 : f32
    %44 = vector.broadcast %cst_14 : f32 to vector<64x16xf32>
    %45 = arith.mulf %44, %43 : vector<64x16xf32>
    %46 = arith.maximumf %43, %45 : vector<64x16xf32>
    %cst_15 = arith.constant -1.000000e+30 : f32
    %47 = vector.broadcast %cst_15 : f32 to vector<64x16xf32>
    %48 = arith.select %11, %46, %47 : vector<64x16xi1>, vector<64x16xf32>
    %cst_16 = arith.constant dense<0xFF800000> : vector<64xf32>
    %49 = vector.multi_reduction <maximumf>, %48, %cst_16 [1] : vector<64x16xf32> to vector<64xf32>
    %50 = vector.shape_cast %49 : vector<64xf32> to vector<64x1xf32>
    %51 = vector.broadcast %50 : vector<64x1xf32> to vector<64x16xf32>
    %52 = arith.subf %48, %51 : vector<64x16xf32>
    %53 = math.exp %52 : vector<64x16xf32>
    %cst_17 = arith.constant 0.000000e+00 : f32
    %54 = vector.broadcast %cst_17 : f32 to vector<64x16xf32>
    %55 = arith.select %11, %53, %54 : vector<64x16xi1>, vector<64x16xf32>
    %cst_18 = arith.constant dense<0.000000e+00> : vector<64xf32>
    %56 = vector.multi_reduction <add>, %55, %cst_18 [1] : vector<64x16xf32> to vector<64xf32>
    %57 = vector.shape_cast %56 : vector<64xf32> to vector<64x1xf32>
    %cst_19 = arith.constant 1.000000e-30 : f32
    %58 = vector.broadcast %cst_19 : f32 to vector<64x1xf32>
    %59 = arith.maximumf %57, %58 : vector<64x1xf32>
    %60 = tpu.reciprocal %59 {approx = true} : vector<64x1xf32> -> vector<64x1xf32>
    %61 = vector.broadcast %60 : vector<64x1xf32> to vector<64x16xf32>
    %62 = arith.mulf %55, %61 : vector<64x16xf32>
    %63 = arith.truncf %62 : vector<64x16xf32> to vector<64x16xbf16>
    %cst_20 = arith.constant dense<0.000000e+00> : vector<64x32xf32>
    %64 = tpu.matmul %63, %20, %cst_20 {dimension_numbers = #tpu.dot_dimension_numbers<[1], [0], [0], [1], [0, 0, 1, 1], [], []>} : vector<64x16xbf16>, vector<16x32xbf16>, vector<64x32xf32> -> vector<64x32xf32>
    %65 = vector.extract_strided_slice %64 {offsets = [0, 0], sizes = [16, 32], strides = [1, 1]} : vector<64x32xf32> to vector<16x32xf32>
    %66 = vector.extract_strided_slice %13 {offsets = [0, 0], sizes = [1, 32], strides = [1, 1]} : vector<4x32xf32> to vector<1x32xf32>
    %67 = vector.broadcast %66 : vector<1x32xf32> to vector<16x32xf32>
    %68 = arith.mulf %65, %67 : vector<16x32xf32>
    %69 = vector.broadcast %14 : vector<1x32xf32> to vector<16x32xf32>
    %70 = arith.addf %69, %68 : vector<16x32xf32>
    %71 = vector.extract_strided_slice %64 {offsets = [16, 0], sizes = [16, 32], strides = [1, 1]} : vector<64x32xf32> to vector<16x32xf32>
    %72 = vector.extract_strided_slice %13 {offsets = [1, 0], sizes = [1, 32], strides = [1, 1]} : vector<4x32xf32> to vector<1x32xf32>
    %73 = vector.broadcast %72 : vector<1x32xf32> to vector<16x32xf32>
    %74 = arith.mulf %71, %73 : vector<16x32xf32>
    %75 = arith.addf %70, %74 : vector<16x32xf32>
    %76 = vector.extract_strided_slice %64 {offsets = [32, 0], sizes = [16, 32], strides = [1, 1]} : vector<64x32xf32> to vector<16x32xf32>
    %77 = vector.extract_strided_slice %13 {offsets = [2, 0], sizes = [1, 32], strides = [1, 1]} : vector<4x32xf32> to vector<1x32xf32>
    %78 = vector.broadcast %77 : vector<1x32xf32> to vector<16x32xf32>
    %79 = arith.mulf %76, %78 : vector<16x32xf32>
    %80 = arith.addf %75, %79 : vector<16x32xf32>
    %81 = vector.extract_strided_slice %64 {offsets = [48, 0], sizes = [16, 32], strides = [1, 1]} : vector<64x32xf32> to vector<16x32xf32>
    %82 = vector.extract_strided_slice %13 {offsets = [3, 0], sizes = [1, 32], strides = [1, 1]} : vector<4x32xf32> to vector<1x32xf32>
    %83 = vector.broadcast %82 : vector<1x32xf32> to vector<16x32xf32>
    %84 = arith.mulf %81, %83 : vector<16x32xf32>
    %85 = arith.addf %80, %84 : vector<16x32xf32>
    %cst_21 = arith.constant 0.000000e+00 : f32
    %86 = vector.broadcast %cst_21 : f32 to vector<16x32xf32>
    %87 = arith.cmpf ogt, %85, %86 : vector<16x32xf32>
    %88 = math.exp %85 : vector<16x32xf32>
    %cst_22 = arith.constant 1.000000e+00 : f32
    %89 = vector.broadcast %cst_22 : f32 to vector<16x32xf32>
    %90 = arith.subf %88, %89 : vector<16x32xf32>
    %91 = arith.select %87, %85, %90 : vector<16x32xi1>, vector<16x32xf32>
    %92 = vector.extract_strided_slice %6 {offsets = [0, 0], sizes = [1, 8], strides = [1, 1]} : vector<2x8xf32> to vector<1x8xf32>
    %93 = vector.extract_strided_slice %6 {offsets = [1, 0], sizes = [1, 8], strides = [1, 1]} : vector<2x8xf32> to vector<1x8xf32>
    %94 = arith.truncf %91 : vector<16x32xf32> to vector<16x32xbf16>
    %95 = arith.truncf %5 : vector<32x9xf32> to vector<32x9xbf16>
    %cst_23 = arith.constant dense<0.000000e+00> : vector<16x9xf32>
    %96 = tpu.matmul %94, %95, %cst_23 {dimension_numbers = #tpu.dot_dimension_numbers<[1], [0], [0], [1], [0, 0, 1, 1], [], []>} : vector<16x32xbf16>, vector<32x9xbf16>, vector<16x9xf32> -> vector<16x9xf32>
    %97 = vector.extract_strided_slice %96 {offsets = [0, 0], sizes = [16, 8], strides = [1, 1]} : vector<16x9xf32> to vector<16x8xf32>
    %98 = vector.extract_strided_slice %96 {offsets = [0, 8], sizes = [16, 1], strides = [1, 1]} : vector<16x9xf32> to vector<16x1xf32>
    %99 = arith.truncf %97 : vector<16x8xf32> to vector<16x8xbf16>
    %100 = arith.truncf %92 : vector<1x8xf32> to vector<1x8xbf16>
    "tpu.trace_start"() <{level = 10 : i32, message = "hf,nf->hn"}> : () -> ()
    %cst_24 = arith.constant dense<0.000000e+00> : vector<1x16xf32>
    %101 = tpu.matmul %100, %99, %cst_24 {dimension_numbers = #tpu.dot_dimension_numbers<[1], [1], [0], [0], [0, 0, 1, 0], [], []>} : vector<1x8xbf16>, vector<16x8xbf16>, vector<1x16xf32> -> vector<1x16xf32>
    "tpu.trace_stop"() : () -> ()
    %102 = vector.broadcast %98 : vector<16x1xf32> to vector<16x16xf32>
    %103 = vector.broadcast %101 : vector<1x16xf32> to vector<16x16xf32>
    %104 = arith.addf %102, %103 : vector<16x16xf32>
    %cst_25 = arith.constant 2.000000e-01 : f32
    %105 = vector.broadcast %cst_25 : f32 to vector<16x16xf32>
    %106 = arith.mulf %105, %104 : vector<16x16xf32>
    %107 = arith.maximumf %104, %106 : vector<16x16xf32>
    %cst_26 = arith.constant -1.000000e+30 : f32
    %108 = vector.broadcast %cst_26 : f32 to vector<16x16xf32>
    %109 = arith.select %8, %107, %108 : vector<16x16xi1>, vector<16x16xf32>
    %cst_27 = arith.constant dense<0xFF800000> : vector<16xf32>
    %110 = vector.multi_reduction <maximumf>, %109, %cst_27 [1] : vector<16x16xf32> to vector<16xf32>
    %111 = vector.shape_cast %110 : vector<16xf32> to vector<16x1xf32>
    %112 = vector.broadcast %111 : vector<16x1xf32> to vector<16x16xf32>
    %113 = arith.subf %109, %112 : vector<16x16xf32>
    %114 = math.exp %113 : vector<16x16xf32>
    %cst_28 = arith.constant 0.000000e+00 : f32
    %115 = vector.broadcast %cst_28 : f32 to vector<16x16xf32>
    %116 = arith.select %8, %114, %115 : vector<16x16xi1>, vector<16x16xf32>
    %cst_29 = arith.constant dense<0.000000e+00> : vector<16xf32>
    %117 = vector.multi_reduction <add>, %116, %cst_29 [1] : vector<16x16xf32> to vector<16xf32>
    %118 = vector.shape_cast %117 : vector<16xf32> to vector<16x1xf32>
    %cst_30 = arith.constant 1.000000e-30 : f32
    %119 = vector.broadcast %cst_30 : f32 to vector<16x1xf32>
    %120 = arith.maximumf %118, %119 : vector<16x1xf32>
    %121 = tpu.reciprocal %120 {approx = true} : vector<16x1xf32> -> vector<16x1xf32>
    %122 = vector.broadcast %121 : vector<16x1xf32> to vector<16x16xf32>
    %123 = arith.mulf %116, %122 : vector<16x16xf32>
    %124 = arith.truncf %123 : vector<16x16xf32> to vector<16x16xbf16>
    %cst_31 = arith.constant dense<0.000000e+00> : vector<16x8xf32>
    %125 = tpu.matmul %124, %99, %cst_31 {dimension_numbers = #tpu.dot_dimension_numbers<[1], [0], [0], [1], [0, 0, 1, 1], [], []>} : vector<16x16xbf16>, vector<16x8xbf16>, vector<16x8xf32> -> vector<16x8xf32>
    %126 = vector.broadcast %93 : vector<1x8xf32> to vector<16x8xf32>
    %127 = arith.addf %125, %126 : vector<16x8xf32>
    %c0_32 = arith.constant 0 : index
    %c0_33 = arith.constant 0 : index
    %128 = vector.load %arg7[%c0_32, %c0_33] : memref<16x8xf32, #tpu.memory_space<vmem>>, vector<16x8xf32>
    tpu.vector_store %arg7[%c0_32, %c0_33], %127 {strides = array<i32>} : memref<16x8xf32, #tpu.memory_space<vmem>>, vector<16x8xf32>,
    return
  }
  func.func @transform_0(%arg0: i32) -> (i32, i32) {
    %c0_i32 = arith.constant 0 : i32
    %c0_i32_0 = arith.constant 0 : i32
    %c0_i32_1 = arith.constant 0 : i32
    return %c0_i32, %c0_i32_0 : i32, i32
  }
  func.func @transform_1(%arg0: i32) -> (i32, i32) {
    %c0_i32 = arith.constant 0 : i32
    %c0_i32_0 = arith.constant 0 : i32
    %c0_i32_1 = arith.constant 0 : i32
    return %c0_i32, %c0_i32_0 : i32, i32
  }
  func.func @transform_2(%arg0: i32) -> (i32, i32) {
    %c0_i32 = arith.constant 0 : i32
    %c0_i32_0 = arith.constant 0 : i32
    %c0_i32_1 = arith.constant 0 : i32
    return %c0_i32, %c0_i32_0 : i32, i32
  }
  func.func @transform_3(%arg0: i32) -> (i32, i32) {
    %c0_i32 = arith.constant 0 : i32
    %c0_i32_0 = arith.constant 0 : i32
    %c0_i32_1 = arith.constant 0 : i32
    return %c0_i32, %c0_i32_0 : i32, i32
  }
  func.func @transform_4(%arg0: i32) -> (i32, i32) {
    %c0_i32 = arith.constant 0 : i32
    %c0_i32_0 = arith.constant 0 : i32
    %c0_i32_1 = arith.constant 0 : i32
    return %c0_i32, %c0_i32_0 : i32, i32
  }
  func.func @transform_5(%arg0: i32) -> (i32, i32) {
    %c0_i32 = arith.constant 0 : i32
    %c0_i32_0 = arith.constant 0 : i32
    %c0_i32_1 = arith.constant 0 : i32
    return %c0_i32, %c0_i32_0 : i32, i32
  }
  func.func @transform_6(%arg0: i32) -> (i32, i32) {
    %c0_i32 = arith.constant 0 : i32
    %c0_i32_0 = arith.constant 0 : i32
    %c0_i32_1 = arith.constant 0 : i32
    return %c0_i32, %c0_i32_0 : i32, i32
  }
}

</mosaic_0001>

<bundles_post_ra>
// kernel: gat_forward.1
= control target key start
LH: loop header
LB: loop body
LE: loop exit
PB: predicated region body
PF: predicated region fallthrough
CT: control target
= control target key end

     0   :  { %v787_v0 = vmov 0.0   ;;  %vm48_vm0 = vcmask 1043456   ;;  %vm788_vm1 = vmmov 0   ;;  %v789_v5 = vmov 33   ;;  %s989_s2 = inlined_call_operand.vmem [shape: f32[8,36], index: 2, kind: input, shape index: {}]   ;;  %s990_s0 = inlined_call_operand.vmem [shape: f32[16,8], index: 0, kind: input, shape index: {}]   ;;  %s991_s3 = inlined_call_operand.vmem [shape: f32[9,32], index: 3, kind: input, shape index: {}]   ;;  %s992_s1 = inlined_call_operand.vmem [shape: s8[16,16], index: 1, kind: input, shape index: {}]   ;;  %s993_s4 = inlined_call_operand.vmem [shape: f32[32,9], index: 4, kind: input, shape index: {}]   ;;  %s994_s5 = inlined_call_operand.vmem [shape: f32[2,8], index: 5, kind: input, shape index: {}]   ;;  %s995_s6 = inlined_call_operand.vmem [shape: f32[16,8], index: 6, kind: output, shape index: {}]  }
   0x1   :  { %686 = vmatprep.subr.bf16.mxu0 %v787_v0  ;;  %v32_v1 = vld [vmem:[%s989_s2] sm:$0xff]  ;;  %688 = vmatprep.mubr.msk.bf16.mxu0 %vm788_vm1, %v787_v0  ;;  %v31_v3 = vld [vmem:[%s990_s0 + $0x8] sm:$0xff]  ;;  %v790_v6 = vmov 32   ;;  %vm44_vm2 = vcmask 64512   ;;  %vm95_vm3 = vcmask 261120   ;;  %v791_v16 = vmov 34  }
   0x2   :  { %v30_v2 = vld [vmem:[%s990_s0] sm:$0xff]  ;;  %v43_v4 = vpack.c.bf16 %v32_v1, %v32_v1  ;;  %736 = vset.pattern.permute.xlu1 %v789_v5  ;;  %735 = vset.pattern.permute.xlu0 %v790_v6  ;;  %v792_v18 = vmov 35   ;;  %v152_v21 = vlaneseq  ;;  %vm224_vm5 = vcmask 130048  }
   0x3   :  { %692 = vmatprep.subr.bf16.mxu1 %v787_v0  ;;  %694 = vmatprep.mubr.msk.bf16.mxu1 %vm788_vm1, %v787_v0  ;;  %v42_v8 = vpack.c.bf16 %v31_v3, %v30_v2  ;;  %v849_v15 = vld [vmem:[%s991_s3] sm:$0xff] }
   0x4   :  { %v50_v7 = vsel %vm48_vm0, %v43_v4, 0  ;;  %v94_v17 = vpack.c.bf16 %v849_v15, %v849_v15  ;;  %v667_v22 = vld [vmem:[%s992_s1] sm:$0xf]   ;;  %v861_v25 = vshrl.u32 %v152_v21, 7 }
   0x5   :  { %687 = vmatpush3.bf16.msra.mxu0 %v50_v7  ;;  %v669_v26 = vunpack.c.1.s8 %v667_v22  ;;  %v668_v27 = vunpack.c.0.s8 %v667_v22 }
   0x6   :  { %v154_v28 = vsub.s32 0, %v861_v25  ;;  %v168_v29 = vsub.s32 1, %v861_v25  ;;  %v182_v30 = vsub.s32 2, %v861_v25  ;;  %v196_v31 = vsub.s32 3, %v861_v25 }
   0x7   :  { %v867_v32 = vcvt.s32.f32 %v669_v26  ;;  %v869_v36 = vcvt.s32.f32 %v668_v27 }
   0x8   :  { %689 = vmatmul.mubr.msk.bf16.vlgmr.msra.gmra.mrb[0].mxu0 %vm44_vm2, %v42_v8 }
   0x9   :  { %vm41_vm4 = vcmp.gt.f32.partialorder %v867_v32, 0.0  ;;  %vm40_vm6 = vcmp.gt.f32.partialorder %v869_v36, 0.0 }
  0xdb   :  { %v86_v9 = vpop.f32.mrb[0].mxu0 }
  0xdc   :  { %159 = vperm.xlu1 %736, %v86_v9   ;;  %144 = vperm.xlu0 %735, %v86_v9   ;;  %v690_v10 = vpop.f32.mrb[1].mxu0 }
  0xdd   :  { %v89_v11 = vpop.f32.mrb[2].mxu0 }
  0xde   :  { %v691_v12 = vpop.f32.mrb[3].mxu0  ;;  %v93_v13 = vpack.c.bf16 %v89_v11, %v86_v9 }
  0xe0   :  { %163 = vperm.xlu1 %736, %v89_v11   ;;  %149 = vperm.xlu0 %735, %v89_v11   ;;  %v100_v14 = vsel %vm95_vm3, %v93_v13, 0 }
  0xe1   :  { %698 = vmatprep.subr.bf16.mxu0 %v93_v13  ;;  %693 = vmatpush3.bf16.xpose.msra.mxu1 %v100_v14 }
  0xe2   :  { %699 = vmatpush3.bf16.msra.mxu0 %v93_v13  ;;  %708 = vmatprep.subr.bf16.mxu1 %v787_v0 }
  0xe3   :  { %722 = vmatprep.subr.bf16.mxu0 %v787_v0 }
  0xe4   :  { %738 = vset.pattern.permute.xlu1 %v791_v16  ;;  %737 = vset.pattern.permute.xlu0 %v791_v16 }
  0xe5   :  { %177 = vperm.xlu1 %738, %v89_v11   ;;  %173 = vperm.xlu0 %737, %v86_v9  }
  0xe8   :  { %695 = vmatmul.mubr.msk.bf16.vlgmr.msra.gmra.mrb[0].mxu1 %vm95_vm3, %v94_v17 }
  0xe9   :  { %739 = vset.pattern.permute.xlu1 %v792_v18  ;;  %740 = vset.pattern.permute.xlu0 %v792_v18 }
  0xea   :  { %187 = vperm.xlu1 %739, %v86_v9   ;;  %191 = vperm.xlu0 %740, %v89_v11  }
  0xeb   :  { %712 = vmatprep.mubr.msk.bf16.mxu1 %vm788_vm1, %v787_v0 }
 0x15b   :  { %v160_v19 = vpop.permute.xlu1 %159  ;;  %v145_v20 = vpop.permute.xlu0 %144 }
 0x15f   :  { %v164_v23 = vpop.permute.xlu1 %163  ;;  %v150_v24 = vpop.permute.xlu0 %149 }
 0x164   :  { %v178_v33 = vpop.permute.xlu1 %177  ;;  %v174_v34 = vpop.permute.xlu0 %173 }
 0x169   :  { %v188_v50 = vpop.permute.xlu1 %187  ;;  %v192_v51 = vpop.permute.xlu0 %191 }
 0x1bb   :  { %v136_v35 = vpop.f32.mrb[0].mxu1 }
 0x1bc   :  { %v155_v37 = vrot.slane %v136_v35, %v154_v28  ;;  %v169_v38 = vrot.slane %v136_v35, %v168_v29  ;;  %v183_v39 = vrot.slane %v136_v35, %v182_v30  ;;  %v696_v40 = vpop.f32.mrb[1].mxu1  ;;  %v197_v41 = vrot.slane %v136_v35, %v196_v31 }
 0x1bd   :  { %v139_v42 = vpop.f32.mrb[2].mxu1 }
 0x1be   :  { %v697_v43 = vpop.f32.mrb[3].mxu1  ;;  %v157_v44 = vadd.f32 %v155_v37, %v150_v24  ;;  %v156_v45 = vadd.f32 %v155_v37, %v145_v20  ;;  %v171_v46 = vadd.f32 %v169_v38, %v164_v23  ;;  %v170_v47 = vadd.f32 %v169_v38, %v160_v19 }
 0x1bf   :  { %v185_v48 = vadd.f32 %v183_v39, %v178_v33  ;;  %v184_v49 = vadd.f32 %v183_v39, %v174_v34  ;;  %v199_v57 = vadd.f32 %v197_v41, %v192_v51  ;;  %v198_v58 = vadd.f32 %v197_v41, %v188_v50 }
 0x1c0   :  { %v201_v52 = vmul.f32 0.2, %v157_v44  ;;  %v200_v53 = vmul.f32 0.2, %v156_v45  ;;  %v203_v54 = vmul.f32 0.2, %v171_v46 }
 0x1c1   :  { %v202_v55 = vmul.f32 0.2, %v170_v47  ;;  %v205_v56 = vmul.f32 0.2, %v185_v48  ;;  %v204_v62 = vmul.f32 0.2, %v184_v49 }
 0x1c2   :  { %v209_v59 = vmax.f32 %v157_v44, %v201_v52  ;;  %v208_v60 = vmax.f32 %v156_v45, %v200_v53  ;;  %v211_v61 = vmax.f32 %v171_v46, %v203_v54  ;;  %v207_v6 = vmul.f32 0.2, %v199_v57 }
 0x1c3   :  { %v210_v63 = vmax.f32 %v170_v47, %v202_v55  ;;  %v213_v5 = vmax.f32 %v185_v48, %v205_v56  ;;  %v212_v9 = vmax.f32 %v184_v49, %v204_v62  ;;  %v206_v10 = vmul.f32 0.2, %v198_v58 }
 0x1c4   :  { %v217_v1 = vsel %vm41_vm4, %v209_v59, -1e+30  ;;  %v216_v2 = vsel %vm40_vm6, %v208_v60, -1e+30  ;;  %v219_v7 = vsel %vm41_vm4, %v211_v61, -1e+30  ;;  %v215_v16 = vmax.f32 %v199_v57, %v207_v6 }
 0x1c5   :  { %v228_v3 = vsel %vm224_vm5, %v217_v1, -inf  ;;  %v225_v4 = vsel %vm224_vm5, %v216_v2, -inf  ;;  %v218_v8 = vsel %vm40_vm6, %v210_v63, -1e+30  ;;  %v234_v11 = vsel %vm224_vm5, %v219_v7, -inf }
 0x1c6   :  { %229 = vmax.xlane.f32.xlu0 %v228_v3  ;;  %226 = vmax.xlane.f32.xlu1 %v225_v4  ;;  %v231_v12 = vsel %vm224_vm5, %v218_v8, -inf  ;;  %v221_v13 = vsel %vm41_vm4, %v213_v5, -1e+30  ;;  %v220_v14 = vsel %vm40_vm6, %v212_v9, -1e+30  ;;  %v214_v17 = vmax.f32 %v198_v58, %v206_v10 }
 0x1c7   :  { %v240_v18 = vsel %vm224_vm5, %v221_v13, -inf  ;;  %v237_v19 = vsel %vm224_vm5, %v220_v14, -inf  ;;  %v223_v20 = vsel %vm41_vm4, %v215_v16, -1e+30 }
 0x1c8   :  { %v222_v21 = vsel %vm40_vm6, %v214_v17, -1e+30  ;;  %v246_v22 = vsel %vm224_vm5, %v223_v20, -inf }
 0x1c9   :  { %v243_v23 = vsel %vm224_vm5, %v222_v21, -inf }
 0x1ca   :  { %235 = vmax.xlane.f32.xlu0 %v234_v11  ;;  %232 = vmax.xlane.f32.xlu1 %v231_v12 }
 0x1ce   :  { %241 = vmax.xlane.f32.xlu0 %v240_v18  ;;  %238 = vmax.xlane.f32.xlu1 %v237_v19 }
 0x1d2   :  { %247 = vmax.xlane.f32.xlu0 %v246_v22  ;;  %244 = vmax.xlane.f32.xlu1 %v243_v23 }
 0x253   :  { %v230_v24 = vpop.xlane.xlu0 %229  ;;  %v227_v26 = vpop.xlane.xlu1 %226 }
 0x254   :  { %v250_v27 = vsub.f32 %v217_v1, %v230_v24  ;;  %v249_v30 = vsub.f32 %v216_v2, %v227_v26 }
 0x256   :  { %v259_v31 = vmul.f32 1.442695, %v250_v27  ;;  %v257_v33 = vmul.f32 1.442695, %v249_v30 }
 0x257   :  { %v236_v34 = vpop.xlane.xlu0 %235  ;;  %v233_v35 = vpop.xlane.xlu1 %232 }
 0x258   :  { %743 = vpow2.f32 %v259_v31  ;;  %v252_v37 = vsub.f32 %v219_v7, %v236_v34  ;;  %v251_v38 = vsub.f32 %v218_v8, %v233_v35 }
 0x259   :  { %745 = vpow2.f32 %v257_v33 }
 0x25a   :  { %v263_v39 = vmul.f32 1.442695, %v252_v37  ;;  %v261_v40 = vmul.f32 1.442695, %v251_v38 }
 0x25b   :  { %v242_v41 = vpop.xlane.xlu0 %241  ;;  %v239_v42 = vpop.xlane.xlu1 %238 }
 0x25c   :  { %747 = vpow2.f32 %v263_v39  ;;  %v254_v43 = vsub.f32 %v221_v13, %v242_v41  ;;  %v253_v44 = vsub.f32 %v220_v14, %v239_v42 }
 0x25d   :  { %749 = vpow2.f32 %v261_v40 }
 0x25e   :  { %v267_v45 = vmul.f32 1.442695, %v254_v43  ;;  %v265_v46 = vmul.f32 1.442695, %v253_v44 }
 0x25f   :  { %v248_v47 = vpop.xlane.xlu0 %247  ;;  %v245_v48 = vpop.xlane.xlu1 %244 }
 0x260   :  { %751 = vpow2.f32 %v267_v45  ;;  %v256_v49 = vsub.f32 %v223_v20, %v248_v47  ;;  %v255_v50 = vsub.f32 %v222_v21, %v245_v48 }
 0x261   :  { %753 = vpow2.f32 %v265_v46 }
 0x262   :  { %v744_v51 = vpop.eup %743  ;;  %v271_v52 = vmul.f32 1.442695, %v256_v49  ;;  %v269_v53 = vmul.f32 1.442695, %v255_v50 }
 0x263   :  { %v746_v54 = vpop.eup %745  ;;  %v274_v55 = vsel %vm41_vm4, %v744_v51, 0.0 }
 0x264   :  { %755 = vpow2.f32 %v271_v52  ;;  %v284_v56 = vsel %vm224_vm5, %v274_v55, 0.0  ;;  %v273_v57 = vsel %vm40_vm6, %v746_v54, 0.0 }
 0x265   :  { %757 = vpow2.f32 %v269_v53  ;;  %285 = vadd.xlane.f32.xlu0 %v284_v56  ;;  %v281_v58 = vsel %vm224_vm5, %v273_v57, 0.0  ;;  %v35_v56 = vld [vmem:[%s993_s4] sm:$0xff] }
 0x266   :  { %v748_v59 = vpop.eup %747  ;;  %282 = vadd.xlane.f32.xlu1 %v281_v58 }
 0x267   :  { %v750_v60 = vpop.eup %749  ;;  %v276_v61 = vsel %vm41_vm4, %v748_v59, 0.0  ;;  %v37_v59 = vld [vmem:[%s993_s4 + $0x10] sm:$0xff] }
 0x268   :  { %v290_v62 = vsel %vm224_vm5, %v276_v61, 0.0  ;;  %v275_v63 = vsel %vm40_vm6, %v750_v60, 0.0  ;;  %v38_v60 = vld [vmem:[%s993_s4 + $0x18] sm:$0xff] }
 0x269   :  { %291 = vadd.xlane.f32.xlu0 %v290_v62  ;;  %v287_v1 = vsel %vm224_vm5, %v275_v63, 0.0  ;;  %v793_v62 = vmov 8  }
 0x26a   :  { %v752_v2 = vpop.eup %751  ;;  %288 = vadd.xlane.f32.xlu1 %v287_v1  ;;  %742 = vset.pattern.permute.xlu0 %v793_v62  ;;  %v424_v1 = vsub.s32 5, %v861_v25 }
 0x26b   :  { %v754_v3 = vpop.eup %753  ;;  %v278_v4 = vsel %vm41_vm4, %v752_v2, 0.0  ;;  %741 = vset.pattern.permute.xlu1 %v793_v62 }
 0x26c   :  { %v296_v5 = vsel %vm224_vm5, %v278_v4, 0.0  ;;  %v277_v6 = vsel %vm40_vm6, %v754_v3, 0.0 }
 0x26d   :  { %297 = vadd.xlane.f32.xlu0 %v296_v5  ;;  %v293_v7 = vsel %vm224_vm5, %v277_v6, 0.0  ;;  %v660_v5 = vld [vmem:[%s991_s3 + $0x8] ss:$0 sm:$0xff] }
 0x26e   :  { %v756_v8 = vpop.eup %755  ;;  %294 = vadd.xlane.f32.xlu1 %v293_v7 }
 0x26f   :  { %v758_v9 = vpop.eup %757  ;;  %v280_v10 = vsel %vm41_vm4, %v756_v8, 0.0 }
 0x270   :  { %v302_v11 = vsel %vm224_vm5, %v280_v10, 0.0  ;;  %v279_v12 = vsel %vm40_vm6, %v758_v9, 0.0  ;;  %v432_v9 = vsub.s32 6, %v861_v25 }
 0x271   :  { %303 = vadd.xlane.f32.xlu0 %v302_v11  ;;  %v299_v13 = vsel %vm224_vm5, %v279_v12, 0.0 }
 0x272   :  { %300 = vadd.xlane.f32.xlu1 %v299_v13 }
 0x2f2   :  { %v286_v14 = vpop.xlane.xlu0 %285 }
 0x2f3   :  { %v306_v16 = vmax.f32 %v286_v14, 1e-30  ;;  %v283_v17 = vpop.xlane.xlu1 %282  ;;  %v440_v14 = vsub.s32 7, %v861_v25 }
 0x2f4   :  { %v305_v18 = vmax.f32 %v283_v17, 1e-30 }
 0x2f5   :  { %759 = vrcp.f32 %v306_v16 }
 0x2f6   :  { %761 = vrcp.f32 %v305_v18  ;;  %v292_v19 = vpop.xlane.xlu0 %291 }
 0x2f7   :  { %v308_v20 = vmax.f32 %v292_v19, 1e-30  ;;  %v289_v21 = vpop.xlane.xlu1 %288  ;;  %v433_v19 = vrot.slane %v849_v15, %v432_v9 }
 0x2f8   :  { %v307_v22 = vmax.f32 %v289_v21, 1e-30  ;;  %v441_v21 = vrot.slane %v849_v15, %v440_v14 }
 0x2f9   :  { %763 = vrcp.f32 %v308_v20 }
 0x2fa   :  { %765 = vrcp.f32 %v307_v22  ;;  %v298_v23 = vpop.xlane.xlu0 %297 }
 0x2fb   :  { %v310_v24 = vmax.f32 %v298_v23, 1e-30  ;;  %v295_v26 = vpop.xlane.xlu1 %294 }
 0x2fc   :  { %v309_v27 = vmax.f32 %v295_v26, 1e-30 }
 0x2fd   :  { %767 = vrcp.f32 %v310_v24 }
 0x2fe   :  { %769 = vrcp.f32 %v309_v27  ;;  %v304_v30 = vpop.xlane.xlu0 %303 }
 0x2ff   :  { %v760_v31 = vpop.eup %759  ;;  %v312_v33 = vmax.f32 %v304_v30, 1e-30  ;;  %v301_v34 = vpop.xlane.xlu1 %300 }
 0x300   :  { %v762_v35 = vpop.eup %761  ;;  %v311_v37 = vmax.f32 %v301_v34, 1e-30  ;;  %v322_v38 = vmul.f32 %v760_v31, %v274_v55 }
 0x301   :  { %771 = vrcp.f32 %v312_v33  ;;  %v321_v39 = vmul.f32 %v762_v35, %v273_v57  ;;  %v36_v57 = vld [vmem:[%s993_s4 + $0x8] sm:$0xff] }
 0x302   :  { %773 = vrcp.f32 %v311_v37  ;;  %v457_v58 = vpack.c.bf16 %v36_v57, %v35_v56 }
 0x303   :  { %v764_v40 = vpop.eup %763  ;;  %v329_v41 = vpack.c.bf16 %v322_v38, %v321_v39 }
 0x304   :  { %v766_v42 = vpop.eup %765  ;;  %v324_v43 = vmul.f32 %v764_v40, %v276_v61  ;;  %709 = vmatpush3.bf16.msra.mxu1 %v457_v58  ;;  %v458_v61 = vpack.c.bf16 %v38_v60, %v37_v59 }
 0x305   :  { %v323_v44 = vmul.f32 %v766_v42, %v275_v63  ;;  %700 = vmatprep.mubr.msk.bf16.mxu0 %vm224_vm5, %v329_v41  ;;  %710 = vmatprep.subr.bf16.mxu1 %v787_v0  ;;  %v412_v63 = vsub.s32 4, %v861_v25 }
 0x307   :  { %v768_v45 = vpop.eup %767  ;;  %v330_v46 = vpack.c.bf16 %v324_v43, %v323_v44  ;;  %v413_v2 = vrot.slane %v849_v15, %v412_v63 }
 0x308   :  { %v770_v47 = vpop.eup %769  ;;  %v326_v48 = vmul.f32 %v768_v45, %v278_v4  ;;  %711 = vmatpush3.bf16.msra.mxu1 %v458_v61  ;;  %v425_v4 = vrot.slane %v849_v15, %v424_v1 }
 0x309   :  { %701 = vmatmul.mubr.msk.bf16.vlgmr.msra.gmra.mrb[4].mxu0 %vm224_vm5, %v330_v46  ;;  %v325_v49 = vmul.f32 %v770_v47, %v277_v6  ;;  %716 = vmatprep.subr.bf16.mxu1 %v787_v0 }
 0x30b   :  { %v772_v50 = vpop.eup %771  ;;  %v331_v51 = vpack.c.bf16 %v326_v48, %v325_v49 }
 0x30c   :  { %v774_v52 = vpop.eup %773  ;;  %v328_v53 = vmul.f32 %v772_v50, %v280_v10 }
 0x30d   :  { %704 = vmatprep.mubr.msk.bf16.mxu0 %vm224_vm5, %v331_v51  ;;  %v327_v54 = vmul.f32 %v774_v52, %v279_v12 }
 0x30f   :  { %v332_v55 = vpack.c.bf16 %v328_v53, %v327_v54  ;;  %v39_v53 = vld [vmem:[%s994_s5] sm:$0x3] }
 0x310   :  { %v504_v54 = vpack.c.bf16 %v39_v53, %v39_v53  ;;  %v603_v32 = vrot.slane %v39_v53, %v168_v29 }
 0x311   :  { %705 = vmatmul.mubr.msk.bf16.gmra.mrb[8].mxu0 %vm224_vm5, %v332_v55 }
 0x312   :  { %724 = vmatprep.mubr.msk.bf16.mxu0 %vm788_vm1, %v787_v0 }
 0x3dc   :  { %v702_v3 = vpop.f32.mrb[4].mxu0 }
 0x3dd   :  { %v379_v6 = vpop.f32.mrb[5].mxu0  ;;  %v426_v11 = vmul.f32 %v702_v3, %v425_v4 }
 0x3de   :  { %v414_v7 = vmul.f32 %v413_v2, %v379_v6  ;;  %v703_v8 = vpop.f32.mrb[6].mxu0 }
 0x3df   :  { %v382_v10 = vpop.f32.mrb[7].mxu0  ;;  %v427_v16 = vmul.f32 %v703_v8, %v425_v4 }
 0x3e0   :  { %v420_v12 = vadd.f32 %v660_v5, %v414_v7  ;;  %v415_v13 = vmul.f32 %v413_v2, %v382_v10 }
 0x3e2   :  { %v421_v17 = vadd.f32 %v660_v5, %v415_v13  ;;  %v428_v18 = vadd.f32 %v426_v11, %v420_v12 }
 0x3e4   :  { %v706_v20 = vpop.f32.mrb[8].mxu0  ;;  %v429_v22 = vadd.f32 %v427_v16, %v421_v17 }
 0x3e5   :  { %v395_v23 = vpop.f32.mrb[9].mxu0  ;;  %v442_v30 = vmul.f32 %v706_v20, %v441_v21 }
 0x3e6   :  { %v434_v24 = vmul.f32 %v433_v19, %v395_v23  ;;  %v707_v26 = vpop.f32.mrb[10].mxu0 }
 0x3e7   :  { %v398_v27 = vpop.f32.mrb[11].mxu0  ;;  %v443_v35 = vmul.f32 %v707_v26, %v441_v21 }
 0x3e8   :  { %v436_v31 = vadd.f32 %v434_v24, %v428_v18  ;;  %v435_v33 = vmul.f32 %v433_v19, %v398_v27 }
 0x3ea   :  { %v444_v34 = vadd.f32 %v442_v30, %v436_v31  ;;  %v437_v37 = vadd.f32 %v435_v33, %v429_v22 }
 0x3ec   :  { %v448_v38 = vmul.f32 1.442695, %v444_v34  ;;  %v445_v39 = vadd.f32 %v443_v35, %v437_v37  ;;  %vm446_vm7 = vcmp.gt.f32.partialorder %v444_v34, 0.0 }
 0x3ee   :  { %775 = vpow2.f32 %v448_v38  ;;  %v450_v40 = vmul.f32 1.442695, %v445_v39  ;;  %vm447_vm8 = vcmp.gt.f32.partialorder %v445_v39, 0.0 }
 0x3f0   :  { %777 = vpow2.f32 %v450_v40 }
 0x3f8   :  { %v776_v41 = vpop.eup %775 }
 0x3f9   :  { %v661_v42 = vadd.f32 -1.0, %v776_v41 }
 0x3fa   :  { %v778_v43 = vpop.eup %777 }
 0x3fb   :  { %v662_v15 = vadd.f32 -1.0, %v778_v43  ;;  %v454_v44 = vsel %vm446_vm7, %v444_v34, %v661_v42 }
 0x3fd   :  { %v455_v45 = vsel %vm447_vm8, %v445_v39, %v662_v15 }
 0x3fe   :  { %v456_v46 = vpack.c.bf16 %v455_v45, %v454_v44 }
 0x400   :  { %713 = vmatmul.mubr.msk.bf16.vlgmr.msra.gmra.mrb[4].mxu1 %vm95_vm3, %v456_v46 }
 0x401   :  { %718 = vmatprep.mubr.msk.bf16.mxu1 %vm788_vm1, %v787_v0 }
 0x4d3   :  { %v496_v47 = vpop.f32.mrb[4].mxu1 }
 0x4d4   :  { %553 = vperm.xlu1 %741, %v496_v47   ;;  %v714_v48 = vpop.f32.mrb[5].mxu1 }
 0x4d5   :  { %v499_v49 = vpop.f32.mrb[6].mxu1 }
 0x4d6   :  { %v503_v50 = vpack.c.bf16 %v499_v49, %v496_v47  ;;  %558 = vperm.xlu0 %742, %v499_v49   ;;  %v715_v51 = vpop.f32.mrb[7].mxu1 }
 0x4d8   :  { %723 = vmatpush3.bf16.msra.mxu0 %v503_v50  ;;  %v509_v52 = vsel %vm44_vm2, %v503_v50, 0 }
 0x4d9   :  { %717 = vmatpush3.bf16.xpose.msra.mxu1 %v509_v52 }
 0x4e0   :  { %719 = vmatmul.mubr.msk.bf16.vlgmr.msra.gmra.mrb[8].mxu1 %vm44_vm2, %v504_v54 }
 0x553   :  { %v554_v0 = vpop.permute.xlu1 %553 }
 0x555   :  { %v559_v58 = vpop.permute.xlu0 %558 }
 0x5b3   :  { %v545_v55 = vpop.f32.mrb[8].mxu1 }
 0x5b4   :  { %v564_v56 = vrot.slane %v545_v55, %v154_v28  ;;  %v720_v57 = vpop.f32.mrb[9].mxu1 }
 0x5b5   :  { %v548_v59 = vpop.f32.mrb[10].mxu1 }
 0x5b6   :  { %v565_v60 = vadd.f32 %v564_v56, %v554_v0  ;;  %v566_v61 = vadd.f32 %v564_v56, %v559_v58  ;;  %v721_v62 = vpop.f32.mrb[11].mxu1 }
 0x5b8   :  { %v567_v63 = vmul.f32 0.2, %v565_v60  ;;  %v568_v1 = vmul.f32 0.2, %v566_v61 }
 0x5ba   :  { %v570_v2 = vmax.f32 %v566_v61, %v568_v1  ;;  %v569_v3 = vmax.f32 %v565_v60, %v567_v63 }
 0x5bc   :  { %v572_v4 = vsel %vm41_vm4, %v570_v2, -1e+30  ;;  %v571_v5 = vsel %vm40_vm6, %v569_v3, -1e+30 }
 0x5bd   :  { %v576_v6 = vsel %vm224_vm5, %v572_v4, -inf  ;;  %v573_v28 = vsel %vm224_vm5, %v571_v5, -inf }
 0x5be   :  { %577 = vmax.xlane.f32.xlu0 %v576_v6  ;;  %574 = vmax.xlane.f32.xlu1 %v573_v28 }
 0x64b   :  { %v578_v7 = vpop.xlane.xlu0 %577  ;;  %v575_v8 = vpop.xlane.xlu1 %574 }
 0x64c   :  { %v580_v9 = vsub.f32 %v572_v4, %v578_v7  ;;  %v579_v10 = vsub.f32 %v571_v5, %v575_v8 }
 0x64e   :  { %v583_v11 = vmul.f32 1.442695, %v580_v9  ;;  %v581_v12 = vmul.f32 1.442695, %v579_v10 }
 0x650   :  { %779 = vpow2.f32 %v583_v11 }
 0x651   :  { %781 = vpow2.f32 %v581_v12 }
 0x65a   :  { %v780_v13 = vpop.eup %779 }
 0x65b   :  { %v782_v14 = vpop.eup %781  ;;  %v586_v18 = vsel %vm41_vm4, %v780_v13, 0.0 }
 0x65c   :  { %v585_v16 = vsel %vm40_vm6, %v782_v14, 0.0  ;;  %v590_v19 = vsel %vm224_vm5, %v586_v18, 0.0 }
 0x65d   :  { %v587_v17 = vsel %vm224_vm5, %v585_v16, 0.0 }
 0x65e   :  { %588 = vadd.xlane.f32.xlu1 %v587_v17 }
 0x662   :  { %591 = vadd.xlane.f32.xlu1 %v590_v19 }
 0x6eb   :  { %v589_v20 = vpop.xlane.xlu1 %588 }
 0x6ec   :  { %v593_v21 = vmax.f32 %v589_v20, 1e-30 }
 0x6ee   :  { %783 = vrcp.f32 %v593_v21 }
 0x6ef   :  { %v592_v22 = vpop.xlane.xlu1 %591 }
 0x6f0   :  { %v594_v23 = vmax.f32 %v592_v22, 1e-30 }
 0x6f2   :  { %785 = vrcp.f32 %v594_v23 }
 0x6f8   :  { %v784_v24 = vpop.eup %783 }
 0x6f9   :  { %v597_v27 = vmul.f32 %v784_v24, %v585_v16 }
 0x6fc   :  { %v786_v26 = vpop.eup %785 }
 0x6fd   :  { %v598_v36 = vmul.f32 %v786_v26, %v586_v18 }
 0x6ff   :  { %v599_v30 = vpack.c.bf16 %v598_v36, %v597_v27 }
 0x701   :  { %725 = vmatmul.mubr.msk.bf16.vlgmr.msra.gmra.mrb[12].mxu0 %vm224_vm5, %v599_v30 }
 0x7d4   :  { %v641_v31 = vpop.f32.mrb[12].mxu0 }
 0x7d5   :  { %v642_v33 = vadd.f32 %v641_v31, %v603_v32  ;;  %v726_v34 = vpop.f32.mrb[13].mxu0 }
 0x7d6   :  { %v644_v35 = vpop.f32.mrb[14].mxu0 }
 0x7d7   :  { %648 = vst.msk [vmem:[%s995_s6] sm:$0xff] %vm44_vm2, %v642_v33  ;;  %v645_v37 = vadd.f32 %v644_v35, %v603_v32  ;;  %v727_v38 = vpop.f32.mrb[15].mxu0 }
 0x7d9   :  { %649 = vst.msk [vmem:[%s995_s6 + $0x8] sm:$0xff] %vm44_vm2, %v645_v37 }

</bundles_post_ra>
